<compile_context>
chip_gen: v7x
topology: tpu7x:2x2x1
jax: 0.10.0
libtpu: 0.0.40
codegen_flags: <defaults>
</compile_context>

<pallas_src>
import functools

import jax
import jax.numpy as jnp
from jax import lax
from jax.experimental import pallas as pl
from jax.experimental.pallas import tpu as pltpu

_LANES = 128
_IN, _H1, _H2, _OUT = 10, 5, 3, 1


def _mynet_kernel(x_ref, w1_ref, b1_ref, w2_ref, b2_ref, w3_ref, b3_ref,
                  o_ref, *, chunk):
    """Fused MLP on a lane-dense block.

    x_ref : (10, S, 128) f32 VMEM block  (batch on sublanes x lanes)
    w*/b* : flattened f32 parameters resident in SMEM (scalar reads)
    o_ref : (S, 128) f32 VMEM block
    """
    s_blk = x_ref.shape[1]
    n_chunks = s_blk // chunk

    # Hoist all 68 scalar parameter reads (SMEM -> sregs) out of the loop.
    w1 = [[w1_ref[k * _IN + j] for j in range(_IN)] for k in range(_H1)]
    b1 = [b1_ref[k] for k in range(_H1)]
    w2 = [[w2_ref[k * _H1 + j] for j in range(_H1)] for k in range(_H2)]
    b2 = [b2_ref[k] for k in range(_H2)]
    w3 = [w3_ref[j] for j in range(_H2)]
    b3 = b3_ref[0]

    def body(c, carry):
        r0 = pl.multiple_of(c * chunk, chunk)
        # Load the 10 feature rows of this chunk once; everything below is a
        # lane-dense scalar*vreg FMA on (chunk, 128) slabs (pure f32 VPU work:
        # no MXU, no XLU lane-broadcasts, exact w.r.t. the f32 reference).
        xs = [x_ref[j, pl.ds(r0, chunk), :] for j in range(_IN)]

        h1 = []
        for k in range(_H1):
            acc = b1[k] + w1[k][0] * xs[0]
            for j in range(1, _IN):
                acc = acc + w1[k][j] * xs[j]
            h1.append(jnp.maximum(acc, 0.0))

        h2 = []
        for k in range(_H2):
            acc = b2[k] + w2[k][0] * h1[0]
            for j in range(1, _H1):
                acc = acc + w2[k][j] * h1[j]
            h2.append(jnp.maximum(acc, 0.0))

        y = b3 + w3[0] * h2[0]
        for j in range(1, _H2):
            y = y + w3[j] * h2[j]

        o_ref[pl.ds(r0, chunk), :] = y
        return carry

    lax.fori_loop(0, n_chunks, body, 0)


def _round_up(x, m):
    return ((x + m - 1) // m) * m


def _pick_chunk(s_blk):
    for c in (16, 8):
        if s_blk % c == 0:
            return c
    return s_blk


def mynet_forward(x, params, *, block_elems=65536):
    """MyNet forward.  x: (B, 10) f32.  params in PyTorch layout:
    w{1,2,3}: (out, in), b{1,2,3}: (out,).  Returns (B, 1) f32."""
    B, F = x.shape
    assert F == _IN, x.shape
    w1, b1 = params["w1"], params["b1"]
    w2, b2 = params["w2"], params["b2"]
    w3, b3 = params["w3"], params["b3"]

    # ---- Batch-on-lanes layout: (B,10) -> (10, B/128, 128) ----------------
    b_pad = _round_up(max(B, _LANES), _LANES)
    xt = jnp.transpose(x)                               # (10, B)
    if b_pad != B:
        xt = jnp.pad(xt, ((0, 0), (0, b_pad - B)))      # zero-pad batch
    n_groups = b_pad // _LANES
    xg = xt.reshape(_IN, n_groups, _LANES)              # contiguous reshape

    # ---- Batch tiling ------------------------------------------------------
    # Large tiles amortize the ~0.35us/step grid overhead; the cap keeps the
    # double-buffered working set far under v7x's 32 MiB scoped-VMEM default.
    # For medium/large batches use an even number of roughly equal steps so
    # v7x's two TensorCores are balanced (harmless on single-TC v5e/v6e).
    s_max = min(max(block_elems // _LANES, 8), 2048)
    if n_groups <= 64:
        s_blk = n_groups                                 # single block
    else:
        n_steps = max(2, -(-n_groups // s_max))
        if n_steps % 2:
            n_steps += 1
        s_blk = _round_up(-(-n_groups // n_steps), 8)
    grid = (pl.cdiv(n_groups, s_blk),)
    chunk = _pick_chunk(s_blk)

    smem_spec = pl.BlockSpec(memory_space=pltpu.MemorySpace.SMEM)
    kernel = functools.partial(_mynet_kernel, chunk=chunk)

    out = pl.pallas_call(
        kernel,
        out_shape=jax.ShapeDtypeStruct((n_groups, _LANES), jnp.float32),
        grid=grid,
        in_specs=[
            pl.BlockSpec((_IN, s_blk, _LANES), lambda i: (0, i, 0)),  # x tiles
            smem_spec, smem_spec,            # w1, b1  (SMEM-resident scalars)
            smem_spec, smem_spec,            # w2, b2
            smem_spec, smem_spec,            # w3, b3
        ],
        out_specs=pl.BlockSpec((s_blk, _LANES), lambda i: (i, 0)),
        compiler_params=pltpu.CompilerParams(
            dimension_semantics=("parallel",),           # 2 TCs on v7x
        ),
    )(
        xg,
        w1.reshape(-1), b1.reshape(-1),
        w2.reshape(-1), b2.reshape(-1),
        w3.reshape(-1), b3.reshape(-1),
    )

    # (n_groups, 128) row-major == batch order; drop padding, restore (B, 1).
    return out.reshape(b_pad, 1)[:B]


def init_params(key):
    """Deterministic init, PyTorch layout ((out,in) weights, (out,) biases)."""
    def linear(key, fan_in, fan_out):
        kw, kb = jax.random.split(key)
        bound = 1.0 / jnp.sqrt(fan_in)
        w = jax.random.uniform(kw, (fan_out, fan_in), jnp.float32, -bound, bound)
        b = jax.random.uniform(kb, (fan_out,), jnp.float32, -bound, bound)
        return w, b

    k1, k2, k3 = jax.random.split(key, 3)
    w1, b1 = linear(k1, 10, 5)
    w2, b2 = linear(k2, 5, 3)
    w3, b3 = linear(k3, 3, 1)
    return {"w1": w1, "b1": b1, "w2": w2, "b2": b2, "w3": w3, "b3": b3}


def mynet_ref(x, params):
    """Pure-JAX reference (f32, HIGHEST-precision matmuls)."""
    dot = lambda a, b: jnp.dot(a, b, precision=lax.Precision.HIGHEST)
    h = jnp.maximum(dot(x, params["w1"].T) + params["b1"], 0.0)
    h = jnp.maximum(dot(h, params["w2"].T) + params["b2"], 0.0)
    return dot(h, params["w3"].T) + params["b3"]


if __name__ == "__main__":
    key = jax.random.PRNGKey(0)
    kp, kx1, kx2 = jax.random.split(key, 3)
    params = init_params(kp)

    # Small shape consistent with the module (single-block path, B < 128).
    B1 = 8
    x1 = jax.random.normal(kx1, (B1, _IN), dtype=jnp.float32)
    out1 = jax.block_until_ready(mynet_forward(x1, params))
    ref1 = mynet_ref(x1, params)
    assert out1.shape == (B1, 1), out1.shape
    assert jnp.allclose(out1, ref1, atol=1e-4, rtol=1e-4), (out1, ref1)

    # Larger batch: exercises the transposed multi-step grid (even split for
    # v7x), the in-kernel chunk loop, batch padding, and a partial last block.
    B2 = 9001
    x2 = jax.random.normal(kx2, (B2, _IN), dtype=jnp.float32)
    out2 = jax.block_until_ready(mynet_forward(x2, params))
    ref2 = mynet_ref(x2, params)
    assert out2.shape == (B2, 1), out2.shape
    assert jnp.allclose(out2, ref2, atol=1e-4, rtol=1e-4)

    print("KERNEL_OK")
</pallas_src>

<mosaic_0001>
module attributes {stable_mosaic.version = 11 : i64} {
  func.func @_mynet_kernel(%arg0: i32, %arg1: memref<10x1x128xf32, #tpu.memory_space<vmem>>, %arg2: memref<50xf32, #tpu.memory_space<smem>>, %arg3: memref<5xf32, #tpu.memory_space<smem>>, %arg4: memref<15xf32, #tpu.memory_space<smem>>, %arg5: memref<3xf32, #tpu.memory_space<smem>>, %arg6: memref<3xf32, #tpu.memory_space<smem>>, %arg7: memref<1xf32, #tpu.memory_space<smem>>, %arg8: memref<1x128xf32, #tpu.memory_space<vmem>>) attributes {dimension_semantics = [#tpu.dimension_semantics<parallel>], iteration_bounds = array<i64: 1>, scalar_prefetch = 0 : i64, scratch_operands = 0 : i64, tpu.core_type = #tpu.core_type<tc>, window_params = [{transform_indices = @transform_0, window_bounds = array<i64: 10, 1, 128>}, {transform_indices = @transform_1, window_bounds = array<i64: 50>}, {transform_indices = @transform_2, window_bounds = array<i64: 5>}, {transform_indices = @transform_3, window_bounds = array<i64: 15>}, {transform_indices = @transform_4, window_bounds = array<i64: 3>}, {transform_indices = @transform_5, window_bounds = array<i64: 3>}, {transform_indices = @transform_6, window_bounds = array<i64: 1>}, {transform_indices = @transform_7, window_bounds = array<i64: 1, 128>}]} {
    %c0 = arith.constant 0 : index
    %0 = memref.load %arg2[%c0] : memref<50xf32, #tpu.memory_space<smem>>
    %c1 = arith.constant 1 : index
    %1 = memref.load %arg2[%c1] : memref<50xf32, #tpu.memory_space<smem>>
    %c2 = arith.constant 2 : index
    %2 = memref.load %arg2[%c2] : memref<50xf32, #tpu.memory_space<smem>>
    %c3 = arith.constant 3 : index
    %3 = memref.load %arg2[%c3] : memref<50xf32, #tpu.memory_space<smem>>
    %c4 = arith.constant 4 : index
    %4 = memref.load %arg2[%c4] : memref<50xf32, #tpu.memory_space<smem>>
    %c5 = arith.constant 5 : index
    %5 = memref.load %arg2[%c5] : memref<50xf32, #tpu.memory_space<smem>>
    %c6 = arith.constant 6 : index
    %6 = memref.load %arg2[%c6] : memref<50xf32, #tpu.memory_space<smem>>
    %c7 = arith.constant 7 : index
    %7 = memref.load %arg2[%c7] : memref<50xf32, #tpu.memory_space<smem>>
    %c8 = arith.constant 8 : index
    %8 = memref.load %arg2[%c8] : memref<50xf32, #tpu.memory_space<smem>>
    %c9 = arith.constant 9 : index
    %9 = memref.load %arg2[%c9] : memref<50xf32, #tpu.memory_space<smem>>
    %c10 = arith.constant 10 : index
    %10 = memref.load %arg2[%c10] : memref<50xf32, #tpu.memory_space<smem>>
    %c11 = arith.constant 11 : index
    %11 = memref.load %arg2[%c11] : memref<50xf32, #tpu.memory_space<smem>>
    %c12 = arith.constant 12 : index
    %12 = memref.load %arg2[%c12] : memref<50xf32, #tpu.memory_space<smem>>
    %c13 = arith.constant 13 : index
    %13 = memref.load %arg2[%c13] : memref<50xf32, #tpu.memory_space<smem>>
    %c14 = arith.constant 14 : index
    %14 = memref.load %arg2[%c14] : memref<50xf32, #tpu.memory_space<smem>>
    %c15 = arith.constant 15 : index
    %15 = memref.load %arg2[%c15] : memref<50xf32, #tpu.memory_space<smem>>
    %c16 = arith.constant 16 : index
    %16 = memref.load %arg2[%c16] : memref<50xf32, #tpu.memory_space<smem>>
    %c17 = arith.constant 17 : index
    %17 = memref.load %arg2[%c17] : memref<50xf32, #tpu.memory_space<smem>>
    %c18 = arith.constant 18 : index
    %18 = memref.load %arg2[%c18] : memref<50xf32, #tpu.memory_space<smem>>
    %c19 = arith.constant 19 : index
    %19 = memref.load %arg2[%c19] : memref<50xf32, #tpu.memory_space<smem>>
    %c20 = arith.constant 20 : index
    %20 = memref.load %arg2[%c20] : memref<50xf32, #tpu.memory_space<smem>>
    %c21 = arith.constant 21 : index
    %21 = memref.load %arg2[%c21] : memref<50xf32, #tpu.memory_space<smem>>
    %c22 = arith.constant 22 : index
    %22 = memref.load %arg2[%c22] : memref<50xf32, #tpu.memory_space<smem>>
    %c23 = arith.constant 23 : index
    %23 = memref.load %arg2[%c23] : memref<50xf32, #tpu.memory_space<smem>>
    %c24 = arith.constant 24 : index
    %24 = memref.load %arg2[%c24] : memref<50xf32, #tpu.memory_space<smem>>
    %c25 = arith.constant 25 : index
    %25 = memref.load %arg2[%c25] : memref<50xf32, #tpu.memory_space<smem>>
    %c26 = arith.constant 26 : index
    %26 = memref.load %arg2[%c26] : memref<50xf32, #tpu.memory_space<smem>>
    %c27 = arith.constant 27 : index
    %27 = memref.load %arg2[%c27] : memref<50xf32, #tpu.memory_space<smem>>
    %c28 = arith.constant 28 : index
    %28 = memref.load %arg2[%c28] : memref<50xf32, #tpu.memory_space<smem>>
    %c29 = arith.constant 29 : index
    %29 = memref.load %arg2[%c29] : memref<50xf32, #tpu.memory_space<smem>>
    %c30 = arith.constant 30 : index
    %30 = memref.load %arg2[%c30] : memref<50xf32, #tpu.memory_space<smem>>
    %c31 = arith.constant 31 : index
    %31 = memref.load %arg2[%c31] : memref<50xf32, #tpu.memory_space<smem>>
    %c32 = arith.constant 32 : index
    %32 = memref.load %arg2[%c32] : memref<50xf32, #tpu.memory_space<smem>>
    %c33 = arith.constant 33 : index
    %33 = memref.load %arg2[%c33] : memref<50xf32, #tpu.memory_space<smem>>
    %c34 = arith.constant 34 : index
    %34 = memref.load %arg2[%c34] : memref<50xf32, #tpu.memory_space<smem>>
    %c35 = arith.constant 35 : index
    %35 = memref.load %arg2[%c35] : memref<50xf32, #tpu.memory_space<smem>>
    %c36 = arith.constant 36 : index
    %36 = memref.load %arg2[%c36] : memref<50xf32, #tpu.memory_space<smem>>
    %c37 = arith.constant 37 : index
    %37 = memref.load %arg2[%c37] : memref<50xf32, #tpu.memory_space<smem>>
    %c38 = arith.constant 38 : index
    %38 = memref.load %arg2[%c38] : memref<50xf32, #tpu.memory_space<smem>>
    %c39 = arith.constant 39 : index
    %39 = memref.load %arg2[%c39] : memref<50xf32, #tpu.memory_space<smem>>
    %c40 = arith.constant 40 : index
    %40 = memref.load %arg2[%c40] : memref<50xf32, #tpu.memory_space<smem>>
    %c41 = arith.constant 41 : index
    %41 = memref.load %arg2[%c41] : memref<50xf32, #tpu.memory_space<smem>>
    %c42 = arith.constant 42 : index
    %42 = memref.load %arg2[%c42] : memref<50xf32, #tpu.memory_space<smem>>
    %c43 = arith.constant 43 : index
    %43 = memref.load %arg2[%c43] : memref<50xf32, #tpu.memory_space<smem>>
    %c44 = arith.constant 44 : index
    %44 = memref.load %arg2[%c44] : memref<50xf32, #tpu.memory_space<smem>>
    %c45 = arith.constant 45 : index
    %45 = memref.load %arg2[%c45] : memref<50xf32, #tpu.memory_space<smem>>
    %c46 = arith.constant 46 : index
    %46 = memref.load %arg2[%c46] : memref<50xf32, #tpu.memory_space<smem>>
    %c47 = arith.constant 47 : index
    %47 = memref.load %arg2[%c47] : memref<50xf32, #tpu.memory_space<smem>>
    %c48 = arith.constant 48 : index
    %48 = memref.load %arg2[%c48] : memref<50xf32, #tpu.memory_space<smem>>
    %c49 = arith.constant 49 : index
    %49 = memref.load %arg2[%c49] : memref<50xf32, #tpu.memory_space<smem>>
    %c0_0 = arith.constant 0 : index
    %50 = memref.load %arg3[%c0_0] : memref<5xf32, #tpu.memory_space<smem>>
    %c1_1 = arith.constant 1 : index
    %51 = memref.load %arg3[%c1_1] : memref<5xf32, #tpu.memory_space<smem>>
    %c2_2 = arith.constant 2 : index
    %52 = memref.load %arg3[%c2_2] : memref<5xf32, #tpu.memory_space<smem>>
    %c3_3 = arith.constant 3 : index
    %53 = memref.load %arg3[%c3_3] : memref<5xf32, #tpu.memory_space<smem>>
    %c4_4 = arith.constant 4 : index
    %54 = memref.load %arg3[%c4_4] : memref<5xf32, #tpu.memory_space<smem>>
    %c0_5 = arith.constant 0 : index
    %55 = memref.load %arg4[%c0_5] : memref<15xf32, #tpu.memory_space<smem>>
    %c1_6 = arith.constant 1 : index
    %56 = memref.load %arg4[%c1_6] : memref<15xf32, #tpu.memory_space<smem>>
    %c2_7 = arith.constant 2 : index
    %57 = memref.load %arg4[%c2_7] : memref<15xf32, #tpu.memory_space<smem>>
    %c3_8 = arith.constant 3 : index
    %58 = memref.load %arg4[%c3_8] : memref<15xf32, #tpu.memory_space<smem>>
    %c4_9 = arith.constant 4 : index
    %59 = memref.load %arg4[%c4_9] : memref<15xf32, #tpu.memory_space<smem>>
    %c5_10 = arith.constant 5 : index
    %60 = memref.load %arg4[%c5_10] : memref<15xf32, #tpu.memory_space<smem>>
    %c6_11 = arith.constant 6 : index
    %61 = memref.load %arg4[%c6_11] : memref<15xf32, #tpu.memory_space<smem>>
    %c7_12 = arith.constant 7 : index
    %62 = memref.load %arg4[%c7_12] : memref<15xf32, #tpu.memory_space<smem>>
    %c8_13 = arith.constant 8 : index
    %63 = memref.load %arg4[%c8_13] : memref<15xf32, #tpu.memory_space<smem>>
    %c9_14 = arith.constant 9 : index
    %64 = memref.load %arg4[%c9_14] : memref<15xf32, #tpu.memory_space<smem>>
    %c10_15 = arith.constant 10 : index
    %65 = memref.load %arg4[%c10_15] : memref<15xf32, #tpu.memory_space<smem>>
    %c11_16 = arith.constant 11 : index
    %66 = memref.load %arg4[%c11_16] : memref<15xf32, #tpu.memory_space<smem>>
    %c12_17 = arith.constant 12 : index
    %67 = memref.load %arg4[%c12_17] : memref<15xf32, #tpu.memory_space<smem>>
    %c13_18 = arith.constant 13 : index
    %68 = memref.load %arg4[%c13_18] : memref<15xf32, #tpu.memory_space<smem>>
    %c14_19 = arith.constant 14 : index
    %69 = memref.load %arg4[%c14_19] : memref<15xf32, #tpu.memory_space<smem>>
    %c0_20 = arith.constant 0 : index
    %70 = memref.load %arg5[%c0_20] : memref<3xf32, #tpu.memory_space<smem>>
    %c1_21 = arith.constant 1 : index
    %71 = memref.load %arg5[%c1_21] : memref<3xf32, #tpu.memory_space<smem>>
    %c2_22 = arith.constant 2 : index
    %72 = memref.load %arg5[%c2_22] : memref<3xf32, #tpu.memory_space<smem>>
    %c0_23 = arith.constant 0 : index
    %73 = memref.load %arg6[%c0_23] : memref<3xf32, #tpu.memory_space<smem>>
    %c1_24 = arith.constant 1 : index
    %74 = memref.load %arg6[%c1_24] : memref<3xf32, #tpu.memory_space<smem>>
    %c2_25 = arith.constant 2 : index
    %75 = memref.load %arg6[%c2_25] : memref<3xf32, #tpu.memory_space<smem>>
    %c0_26 = arith.constant 0 : index
    %76 = memref.load %arg7[%c0_26] : memref<1xf32, #tpu.memory_space<smem>>
    %c0_i32 = arith.constant 0 : i32
    %c1_i32 = arith.constant 1 : i32
    %77 = arith.muli %c0_i32, %c1_i32 : i32
    %78 = tpu.assume_multiple %77, 1 : i32
    %c0_27 = arith.constant 0 : index
    %79 = arith.index_cast %78 : i32 to index
    %c0_28 = arith.constant 0 : index
    %80 = vector.load %arg1[%c0_27, %79, %c0_28] : memref<10x1x128xf32, #tpu.memory_space<vmem>>, vector<1x1x128xf32>
    %81 = vector.shape_cast %80 : vector<1x1x128xf32> to vector<1x128xf32>
    %c1_29 = arith.constant 1 : index
    %82 = arith.index_cast %78 : i32 to index
    %c0_30 = arith.constant 0 : index
    %83 = vector.load %arg1[%c1_29, %82, %c0_30] : memref<10x1x128xf32, #tpu.memory_space<vmem>>, vector<1x1x128xf32>
    %84 = vector.shape_cast %83 : vector<1x1x128xf32> to vector<1x128xf32>
    %c2_31 = arith.constant 2 : index
    %85 = arith.index_cast %78 : i32 to index
    %c0_32 = arith.constant 0 : index
    %86 = vector.load %arg1[%c2_31, %85, %c0_32] : memref<10x1x128xf32, #tpu.memory_space<vmem>>, vector<1x1x128xf32>
    %87 = vector.shape_cast %86 : vector<1x1x128xf32> to vector<1x128xf32>
    %c3_33 = arith.constant 3 : index
    %88 = arith.index_cast %78 : i32 to index
    %c0_34 = arith.constant 0 : index
    %89 = vector.load %arg1[%c3_33, %88, %c0_34] : memref<10x1x128xf32, #tpu.memory_space<vmem>>, vector<1x1x128xf32>
    %90 = vector.shape_cast %89 : vector<1x1x128xf32> to vector<1x128xf32>
    %c4_35 = arith.constant 4 : index
    %91 = arith.index_cast %78 : i32 to index
    %c0_36 = arith.constant 0 : index
    %92 = vector.load %arg1[%c4_35, %91, %c0_36] : memref<10x1x128xf32, #tpu.memory_space<vmem>>, vector<1x1x128xf32>
    %93 = vector.shape_cast %92 : vector<1x1x128xf32> to vector<1x128xf32>
    %c5_37 = arith.constant 5 : index
    %94 = arith.index_cast %78 : i32 to index
    %c0_38 = arith.constant 0 : index
    %95 = vector.load %arg1[%c5_37, %94, %c0_38] : memref<10x1x128xf32, #tpu.memory_space<vmem>>, vector<1x1x128xf32>
    %96 = vector.shape_cast %95 : vector<1x1x128xf32> to vector<1x128xf32>
    %c6_39 = arith.constant 6 : index
    %97 = arith.index_cast %78 : i32 to index
    %c0_40 = arith.constant 0 : index
    %98 = vector.load %arg1[%c6_39, %97, %c0_40] : memref<10x1x128xf32, #tpu.memory_space<vmem>>, vector<1x1x128xf32>
    %99 = vector.shape_cast %98 : vector<1x1x128xf32> to vector<1x128xf32>
    %c7_41 = arith.constant 7 : index
    %100 = arith.index_cast %78 : i32 to index
    %c0_42 = arith.constant 0 : index
    %101 = vector.load %arg1[%c7_41, %100, %c0_42] : memref<10x1x128xf32, #tpu.memory_space<vmem>>, vector<1x1x128xf32>
    %102 = vector.shape_cast %101 : vector<1x1x128xf32> to vector<1x128xf32>
    %c8_43 = arith.constant 8 : index
    %103 = arith.index_cast %78 : i32 to index
    %c0_44 = arith.constant 0 : index
    %104 = vector.load %arg1[%c8_43, %103, %c0_44] : memref<10x1x128xf32, #tpu.memory_space<vmem>>, vector<1x1x128xf32>
    %105 = vector.shape_cast %104 : vector<1x1x128xf32> to vector<1x128xf32>
    %c9_45 = arith.constant 9 : index
    %106 = arith.index_cast %78 : i32 to index
    %c0_46 = arith.constant 0 : index
    %107 = vector.load %arg1[%c9_45, %106, %c0_46] : memref<10x1x128xf32, #tpu.memory_space<vmem>>, vector<1x1x128xf32>
    %108 = vector.shape_cast %107 : vector<1x1x128xf32> to vector<1x128xf32>
    %109 = vector.broadcast %0 : f32 to vector<1x128xf32>
    %110 = arith.mulf %109, %81 : vector<1x128xf32>
    %111 = vector.broadcast %50 : f32 to vector<1x128xf32>
    %112 = arith.addf %111, %110 : vector<1x128xf32>
    %113 = vector.broadcast %1 : f32 to vector<1x128xf32>
    %114 = arith.mulf %113, %84 : vector<1x128xf32>
    %115 = arith.addf %112, %114 : vector<1x128xf32>
    %116 = vector.broadcast %2 : f32 to vector<1x128xf32>
    %117 = arith.mulf %116, %87 : vector<1x128xf32>
    %118 = arith.addf %115, %117 : vector<1x128xf32>
    %119 = vector.broadcast %3 : f32 to vector<1x128xf32>
    %120 = arith.mulf %119, %90 : vector<1x128xf32>
    %121 = arith.addf %118, %120 : vector<1x128xf32>
    %122 = vector.broadcast %4 : f32 to vector<1x128xf32>
    %123 = arith.mulf %122, %93 : vector<1x128xf32>
    %124 = arith.addf %121, %123 : vector<1x128xf32>
    %125 = vector.broadcast %5 : f32 to vector<1x128xf32>
    %126 = arith.mulf %125, %96 : vector<1x128xf32>
    %127 = arith.addf %124, %126 : vector<1x128xf32>
    %128 = vector.broadcast %6 : f32 to vector<1x128xf32>
    %129 = arith.mulf %128, %99 : vector<1x128xf32>
    %130 = arith.addf %127, %129 : vector<1x128xf32>
    %131 = vector.broadcast %7 : f32 to vector<1x128xf32>
    %132 = arith.mulf %131, %102 : vector<1x128xf32>
    %133 = arith.addf %130, %132 : vector<1x128xf32>
    %134 = vector.broadcast %8 : f32 to vector<1x128xf32>
    %135 = arith.mulf %134, %105 : vector<1x128xf32>
    %136 = arith.addf %133, %135 : vector<1x128xf32>
    %137 = vector.broadcast %9 : f32 to vector<1x128xf32>
    %138 = arith.mulf %137, %108 : vector<1x128xf32>
    %139 = arith.addf %136, %138 : vector<1x128xf32>
    %cst = arith.constant 0.000000e+00 : f32
    %140 = vector.broadcast %cst : f32 to vector<1x128xf32>
    %141 = arith.maximumf %139, %140 : vector<1x128xf32>
    %142 = vector.broadcast %10 : f32 to vector<1x128xf32>
    %143 = arith.mulf %142, %81 : vector<1x128xf32>
    %144 = vector.broadcast %51 : f32 to vector<1x128xf32>
    %145 = arith.addf %144, %143 : vector<1x128xf32>
    %146 = vector.broadcast %11 : f32 to vector<1x128xf32>
    %147 = arith.mulf %146, %84 : vector<1x128xf32>
    %148 = arith.addf %145, %147 : vector<1x128xf32>
    %149 = vector.broadcast %12 : f32 to vector<1x128xf32>
    %150 = arith.mulf %149, %87 : vector<1x128xf32>
    %151 = arith.addf %148, %150 : vector<1x128xf32>
    %152 = vector.broadcast %13 : f32 to vector<1x128xf32>
    %153 = arith.mulf %152, %90 : vector<1x128xf32>
    %154 = arith.addf %151, %153 : vector<1x128xf32>
    %155 = vector.broadcast %14 : f32 to vector<1x128xf32>
    %156 = arith.mulf %155, %93 : vector<1x128xf32>
    %157 = arith.addf %154, %156 : vector<1x128xf32>
    %158 = vector.broadcast %15 : f32 to vector<1x128xf32>
    %159 = arith.mulf %158, %96 : vector<1x128xf32>
    %160 = arith.addf %157, %159 : vector<1x128xf32>
    %161 = vector.broadcast %16 : f32 to vector<1x128xf32>
    %162 = arith.mulf %161, %99 : vector<1x128xf32>
    %163 = arith.addf %160, %162 : vector<1x128xf32>
    %164 = vector.broadcast %17 : f32 to vector<1x128xf32>
    %165 = arith.mulf %164, %102 : vector<1x128xf32>
    %166 = arith.addf %163, %165 : vector<1x128xf32>
    %167 = vector.broadcast %18 : f32 to vector<1x128xf32>
    %168 = arith.mulf %167, %105 : vector<1x128xf32>
    %169 = arith.addf %166, %168 : vector<1x128xf32>
    %170 = vector.broadcast %19 : f32 to vector<1x128xf32>
    %171 = arith.mulf %170, %108 : vector<1x128xf32>
    %172 = arith.addf %169, %171 : vector<1x128xf32>
    %cst_47 = arith.constant 0.000000e+00 : f32
    %173 = vector.broadcast %cst_47 : f32 to vector<1x128xf32>
    %174 = arith.maximumf %172, %173 : vector<1x128xf32>
    %175 = vector.broadcast %20 : f32 to vector<1x128xf32>
    %176 = arith.mulf %175, %81 : vector<1x128xf32>
    %177 = vector.broadcast %52 : f32 to vector<1x128xf32>
    %178 = arith.addf %177, %176 : vector<1x128xf32>
    %179 = vector.broadcast %21 : f32 to vector<1x128xf32>
    %180 = arith.mulf %179, %84 : vector<1x128xf32>
    %181 = arith.addf %178, %180 : vector<1x128xf32>
    %182 = vector.broadcast %22 : f32 to vector<1x128xf32>
    %183 = arith.mulf %182, %87 : vector<1x128xf32>
    %184 = arith.addf %181, %183 : vector<1x128xf32>
    %185 = vector.broadcast %23 : f32 to vector<1x128xf32>
    %186 = arith.mulf %185, %90 : vector<1x128xf32>
    %187 = arith.addf %184, %186 : vector<1x128xf32>
    %188 = vector.broadcast %24 : f32 to vector<1x128xf32>
    %189 = arith.mulf %188, %93 : vector<1x128xf32>
    %190 = arith.addf %187, %189 : vector<1x128xf32>
    %191 = vector.broadcast %25 : f32 to vector<1x128xf32>
    %192 = arith.mulf %191, %96 : vector<1x128xf32>
    %193 = arith.addf %190, %192 : vector<1x128xf32>
    %194 = vector.broadcast %26 : f32 to vector<1x128xf32>
    %195 = arith.mulf %194, %99 : vector<1x128xf32>
    %196 = arith.addf %193, %195 : vector<1x128xf32>
    %197 = vector.broadcast %27 : f32 to vector<1x128xf32>
    %198 = arith.mulf %197, %102 : vector<1x128xf32>
    %199 = arith.addf %196, %198 : vector<1x128xf32>
    %200 = vector.broadcast %28 : f32 to vector<1x128xf32>
    %201 = arith.mulf %200, %105 : vector<1x128xf32>
    %202 = arith.addf %199, %201 : vector<1x128xf32>
    %203 = vector.broadcast %29 : f32 to vector<1x128xf32>
    %204 = arith.mulf %203, %108 : vector<1x128xf32>
    %205 = arith.addf %202, %204 : vector<1x128xf32>
    %cst_48 = arith.constant 0.000000e+00 : f32
    %206 = vector.broadcast %cst_48 : f32 to vector<1x128xf32>
    %207 = arith.maximumf %205, %206 : vector<1x128xf32>
    %208 = vector.broadcast %30 : f32 to vector<1x128xf32>
    %209 = arith.mulf %208, %81 : vector<1x128xf32>
    %210 = vector.broadcast %53 : f32 to vector<1x128xf32>
    %211 = arith.addf %210, %209 : vector<1x128xf32>
    %212 = vector.broadcast %31 : f32 to vector<1x128xf32>
    %213 = arith.mulf %212, %84 : vector<1x128xf32>
    %214 = arith.addf %211, %213 : vector<1x128xf32>
    %215 = vector.broadcast %32 : f32 to vector<1x128xf32>
    %216 = arith.mulf %215, %87 : vector<1x128xf32>
    %217 = arith.addf %214, %216 : vector<1x128xf32>
    %218 = vector.broadcast %33 : f32 to vector<1x128xf32>
    %219 = arith.mulf %218, %90 : vector<1x128xf32>
    %220 = arith.addf %217, %219 : vector<1x128xf32>
    %221 = vector.broadcast %34 : f32 to vector<1x128xf32>
    %222 = arith.mulf %221, %93 : vector<1x128xf32>
    %223 = arith.addf %220, %222 : vector<1x128xf32>
    %224 = vector.broadcast %35 : f32 to vector<1x128xf32>
    %225 = arith.mulf %224, %96 : vector<1x128xf32>
    %226 = arith.addf %223, %225 : vector<1x128xf32>
    %227 = vector.broadcast %36 : f32 to vector<1x128xf32>
    %228 = arith.mulf %227, %99 : vector<1x128xf32>
    %229 = arith.addf %226, %228 : vector<1x128xf32>
    %230 = vector.broadcast %37 : f32 to vector<1x128xf32>
    %231 = arith.mulf %230, %102 : vector<1x128xf32>
    %232 = arith.addf %229, %231 : vector<1x128xf32>
    %233 = vector.broadcast %38 : f32 to vector<1x128xf32>
    %234 = arith.mulf %233, %105 : vector<1x128xf32>
    %235 = arith.addf %232, %234 : vector<1x128xf32>
    %236 = vector.broadcast %39 : f32 to vector<1x128xf32>
    %237 = arith.mulf %236, %108 : vector<1x128xf32>
    %238 = arith.addf %235, %237 : vector<1x128xf32>
    %cst_49 = arith.constant 0.000000e+00 : f32
    %239 = vector.broadcast %cst_49 : f32 to vector<1x128xf32>
    %240 = arith.maximumf %238, %239 : vector<1x128xf32>
    %241 = vector.broadcast %40 : f32 to vector<1x128xf32>
    %242 = arith.mulf %241, %81 : vector<1x128xf32>
    %243 = vector.broadcast %54 : f32 to vector<1x128xf32>
    %244 = arith.addf %243, %242 : vector<1x128xf32>
    %245 = vector.broadcast %41 : f32 to vector<1x128xf32>
    %246 = arith.mulf %245, %84 : vector<1x128xf32>
    %247 = arith.addf %244, %246 : vector<1x128xf32>
    %248 = vector.broadcast %42 : f32 to vector<1x128xf32>
    %249 = arith.mulf %248, %87 : vector<1x128xf32>
    %250 = arith.addf %247, %249 : vector<1x128xf32>
    %251 = vector.broadcast %43 : f32 to vector<1x128xf32>
    %252 = arith.mulf %251, %90 : vector<1x128xf32>
    %253 = arith.addf %250, %252 : vector<1x128xf32>
    %254 = vector.broadcast %44 : f32 to vector<1x128xf32>
    %255 = arith.mulf %254, %93 : vector<1x128xf32>
    %256 = arith.addf %253, %255 : vector<1x128xf32>
    %257 = vector.broadcast %45 : f32 to vector<1x128xf32>
    %258 = arith.mulf %257, %96 : vector<1x128xf32>
    %259 = arith.addf %256, %258 : vector<1x128xf32>
    %260 = vector.broadcast %46 : f32 to vector<1x128xf32>
    %261 = arith.mulf %260, %99 : vector<1x128xf32>
    %262 = arith.addf %259, %261 : vector<1x128xf32>
    %263 = vector.broadcast %47 : f32 to vector<1x128xf32>
    %264 = arith.mulf %263, %102 : vector<1x128xf32>
    %265 = arith.addf %262, %264 : vector<1x128xf32>
    %266 = vector.broadcast %48 : f32 to vector<1x128xf32>
    %267 = arith.mulf %266, %105 : vector<1x128xf32>
    %268 = arith.addf %265, %267 : vector<1x128xf32>
    %269 = vector.broadcast %49 : f32 to vector<1x128xf32>
    %270 = arith.mulf %269, %108 : vector<1x128xf32>
    %271 = arith.addf %268, %270 : vector<1x128xf32>
    %cst_50 = arith.constant 0.000000e+00 : f32
    %272 = vector.broadcast %cst_50 : f32 to vector<1x128xf32>
    %273 = arith.maximumf %271, %272 : vector<1x128xf32>
    %274 = vector.broadcast %55 : f32 to vector<1x128xf32>
    %275 = arith.mulf %274, %141 : vector<1x128xf32>
    %276 = vector.broadcast %70 : f32 to vector<1x128xf32>
    %277 = arith.addf %276, %275 : vector<1x128xf32>
    %278 = vector.broadcast %56 : f32 to vector<1x128xf32>
    %279 = arith.mulf %278, %174 : vector<1x128xf32>
    %280 = arith.addf %277, %279 : vector<1x128xf32>
    %281 = vector.broadcast %57 : f32 to vector<1x128xf32>
    %282 = arith.mulf %281, %207 : vector<1x128xf32>
    %283 = arith.addf %280, %282 : vector<1x128xf32>
    %284 = vector.broadcast %58 : f32 to vector<1x128xf32>
    %285 = arith.mulf %284, %240 : vector<1x128xf32>
    %286 = arith.addf %283, %285 : vector<1x128xf32>
    %287 = vector.broadcast %59 : f32 to vector<1x128xf32>
    %288 = arith.mulf %287, %273 : vector<1x128xf32>
    %289 = arith.addf %286, %288 : vector<1x128xf32>
    %cst_51 = arith.constant 0.000000e+00 : f32
    %290 = vector.broadcast %cst_51 : f32 to vector<1x128xf32>
    %291 = arith.maximumf %289, %290 : vector<1x128xf32>
    %292 = vector.broadcast %60 : f32 to vector<1x128xf32>
    %293 = arith.mulf %292, %141 : vector<1x128xf32>
    %294 = vector.broadcast %71 : f32 to vector<1x128xf32>
    %295 = arith.addf %294, %293 : vector<1x128xf32>
    %296 = vector.broadcast %61 : f32 to vector<1x128xf32>
    %297 = arith.mulf %296, %174 : vector<1x128xf32>
    %298 = arith.addf %295, %297 : vector<1x128xf32>
    %299 = vector.broadcast %62 : f32 to vector<1x128xf32>
    %300 = arith.mulf %299, %207 : vector<1x128xf32>
    %301 = arith.addf %298, %300 : vector<1x128xf32>
    %302 = vector.broadcast %63 : f32 to vector<1x128xf32>
    %303 = arith.mulf %302, %240 : vector<1x128xf32>
    %304 = arith.addf %301, %303 : vector<1x128xf32>
    %305 = vector.broadcast %64 : f32 to vector<1x128xf32>
    %306 = arith.mulf %305, %273 : vector<1x128xf32>
    %307 = arith.addf %304, %306 : vector<1x128xf32>
    %cst_52 = arith.constant 0.000000e+00 : f32
    %308 = vector.broadcast %cst_52 : f32 to vector<1x128xf32>
    %309 = arith.maximumf %307, %308 : vector<1x128xf32>
    %310 = vector.broadcast %65 : f32 to vector<1x128xf32>
    %311 = arith.mulf %310, %141 : vector<1x128xf32>
    %312 = vector.broadcast %72 : f32 to vector<1x128xf32>
    %313 = arith.addf %312, %311 : vector<1x128xf32>
    %314 = vector.broadcast %66 : f32 to vector<1x128xf32>
    %315 = arith.mulf %314, %174 : vector<1x128xf32>
    %316 = arith.addf %313, %315 : vector<1x128xf32>
    %317 = vector.broadcast %67 : f32 to vector<1x128xf32>
    %318 = arith.mulf %317, %207 : vector<1x128xf32>
    %319 = arith.addf %316, %318 : vector<1x128xf32>
    %320 = vector.broadcast %68 : f32 to vector<1x128xf32>
    %321 = arith.mulf %320, %240 : vector<1x128xf32>
    %322 = arith.addf %319, %321 : vector<1x128xf32>
    %323 = vector.broadcast %69 : f32 to vector<1x128xf32>
    %324 = arith.mulf %323, %273 : vector<1x128xf32>
    %325 = arith.addf %322, %324 : vector<1x128xf32>
    %cst_53 = arith.constant 0.000000e+00 : f32
    %326 = vector.broadcast %cst_53 : f32 to vector<1x128xf32>
    %327 = arith.maximumf %325, %326 : vector<1x128xf32>
    %328 = vector.broadcast %73 : f32 to vector<1x128xf32>
    %329 = arith.mulf %328, %291 : vector<1x128xf32>
    %330 = vector.broadcast %76 : f32 to vector<1x128xf32>
    %331 = arith.addf %330, %329 : vector<1x128xf32>
    %332 = vector.broadcast %74 : f32 to vector<1x128xf32>
    %333 = arith.mulf %332, %309 : vector<1x128xf32>
    %334 = arith.addf %331, %333 : vector<1x128xf32>
    %335 = vector.broadcast %75 : f32 to vector<1x128xf32>
    %336 = arith.mulf %335, %327 : vector<1x128xf32>
    %337 = arith.addf %334, %336 : vector<1x128xf32>
    %338 = arith.index_cast %78 : i32 to index
    %c0_54 = arith.constant 0 : index
    %339 = vector.load %arg8[%338, %c0_54] : memref<1x128xf32, #tpu.memory_space<vmem>>, vector<1x128xf32>
    tpu.vector_store %arg8[%338, %c0_54], %337 {strides = array<i32>} : memref<1x128xf32, #tpu.memory_space<vmem>>, vector<1x128xf32>,
    %c1_i32_55 = arith.constant 1 : i32
    return
  }
  func.func @transform_0(%arg0: i32) -> (i32, i32, i32) {
    %c0_i32 = arith.constant 0 : i32
    %c0_i32_0 = arith.constant 0 : i32
    %c0_i32_1 = arith.constant 0 : i32
    return %c0_i32, %arg0, %c0_i32_0 : i32, i32, i32
  }
  func.func @transform_1(%arg0: i32) -> i32 {
    %c0_i32 = arith.constant 0 : i32
    %c0_i32_0 = arith.constant 0 : i32
    return %c0_i32 : i32
  }
  func.func @transform_2(%arg0: i32) -> i32 {
    %c0_i32 = arith.constant 0 : i32
    %c0_i32_0 = arith.constant 0 : i32
    return %c0_i32 : i32
  }
  func.func @transform_3(%arg0: i32) -> i32 {
    %c0_i32 = arith.constant 0 : i32
    %c0_i32_0 = arith.constant 0 : i32
    return %c0_i32 : i32
  }
  func.func @transform_4(%arg0: i32) -> i32 {
    %c0_i32 = arith.constant 0 : i32
    %c0_i32_0 = arith.constant 0 : i32
    return %c0_i32 : i32
  }
  func.func @transform_5(%arg0: i32) -> i32 {
    %c0_i32 = arith.constant 0 : i32
    %c0_i32_0 = arith.constant 0 : i32
    return %c0_i32 : i32
  }
  func.func @transform_6(%arg0: i32) -> i32 {
    %c0_i32 = arith.constant 0 : i32
    %c0_i32_0 = arith.constant 0 : i32
    return %c0_i32 : i32
  }
  func.func @transform_7(%arg0: i32) -> (i32, i32) {
    %c0_i32 = arith.constant 0 : i32
    %c0_i32_0 = arith.constant 0 : i32
    return %arg0, %c0_i32 : i32, i32
  }
}

</mosaic_0001>

<bundles_post_ra>
// kernel: tpu_custom_call.1
= control target key start
LH: loop header
LB: loop body
LE: loop exit
PB: predicated region body
PF: predicated region fallthrough
CT: control target
= control target key end

     0   :  { %13 = vsyncpa [#allocation4], 0  ;;  %s1125_s0 = inlined_call_operand.hbm [shape: f32[10,1,128], index: 0, kind: input, shape index: {}]   ;;  %s1126_s1 = inlined_call_operand.vmem [shape: f32[50], index: 1, kind: input, shape index: {}]   ;;  %s1127_s2 = inlined_call_operand.vmem [shape: f32[5], index: 2, kind: input, shape index: {}]   ;;  %s1128_s3 = inlined_call_operand.vmem [shape: f32[15], index: 3, kind: input, shape index: {}]   ;;  %s1129_s4 = inlined_call_operand.vmem [shape: f32[3], index: 4, kind: input, shape index: {}]   ;;  %s1130_s5 = inlined_call_operand.vmem [shape: f32[3], index: 5, kind: input, shape index: {}]   ;;  %s1131_s6 = inlined_call_operand.<no memory space> [shape: f32[1], index: 6, kind: input, shape index: {}]   ;;  %s1132_s7 = inlined_call_operand.hbm [shape: f32[1,128], index: 7, kind: output, shape index: {}]  }
   0x1   :  { %14 = vsyncpa [#allocation6], 0 }
   0x2   :  { %15 = vsyncpa [#allocation9], 0 }
   0x3   :  { %16 = vsyncpa [#allocation12], 0  ;;  %s46_s26 = sshll.u32 %s1127_s2, 4  ;;  %s47_s26 = int_to_ptr.vmem [resolvable:$true] %s46_s26 }
   0x4   :  { %17 = vsyncpa [#allocation5], 0  ;;  %s66_s29 = sshll.u32 %s1129_s4, 4  ;;  %s535_s30 = scalar_lea.vmem %s47_s26, 16  ;;  %s67_s29 = int_to_ptr.vmem [resolvable:$true] %s66_s29 }
   0x5   :  { %p536_p0 = scmp.ne.s32.totalorder %s47_s26, %s535_s30  ;;  %p540_p1 = scmp.lt.s32.totalorder %s47_s26, %s47_s26 }
   0x6   :  { %p541_p2 = scmp.lt.s32.totalorder %s535_s30, %s535_s30 }
   0x8   :  { %p542_p3 = por %p541_p2, %p540_p1 }
   0xa   :  { %p543_p4 = pnand %p542_p3, %p536_p0 }
   0xc   :  { %546 = shalt.err (!%p543_p4)
}
   0xd   :  { %s649_s8 = smov [#allocation8]   ;;  %s547_s9 = scalar_lea.vmem %s67_s29, 16 }
   0xe   :  { %49 = dma.vmem_to_smem %s47_s26, 16, %s649_s8, [#allocation9]  }
   0xf   :  { %p548_p5 = scmp.ne.s32.totalorder %s67_s29, %s547_s9  ;;  %p552_p6 = scmp.lt.s32.totalorder %s67_s29, %s67_s29 }
  0x10   :  { %p553_p7 = scmp.lt.s32.totalorder %s547_s9, %s547_s9 }
  0x12   :  { %p554_p8 = por %p553_p7, %p552_p6 }
  0x14   :  { %p555_p9 = pnand %p554_p8, %p548_p5 }
  0x16   :  { %558 = shalt.err (!%p555_p9)
}
  0x17   :  { %s650_s2 = smov [#allocation11]   ;;  %s651_s4 = smov [#allocation3]  }
  0x18   :  { %69 = dma.vmem_to_smem %s67_s29, 16, %s650_s2, [#allocation12]  }
  0x19   :  { %s23_s10 = sshll.u32 %s651_s4, 4  ;;  %s36_s13 = sshll.u32 %s1126_s1, 4  ;;  %s24_s10 = int_to_ptr.vmem [resolvable:$true] %s23_s10  ;;  %s37_s13 = int_to_ptr.vmem [resolvable:$true] %s36_s13 }
  0x1a   :  { %s559_s16 = scalar_lea.hbm %s1125_s0, 160 }
  0x1b   :  { %p560_p10 = scmp.ne.s32.totalorder %s1125_s0, %s559_s16  ;;  %p563_p11 = scmp.lt.u32.totalorder %s559_s16, %s1125_s0 }
  0x1d   :  { %p565_p12 = pnand %p563_p11, %p560_p10 }
  0x1f   :  { %568 = shalt.err (!%p565_p12)
}
  0x20   :  { %s569_s21 = scalar_lea.vmem %s24_s10, 160  ;;  %p574_p0 = scmp.lt.s32.totalorder %s24_s10, %s24_s10 }
  0x21   :  { %p570_p13 = scmp.ne.s32.totalorder %s24_s10, %s569_s21  ;;  %p575_p1 = scmp.lt.s32.totalorder %s569_s21, %s569_s21 }
  0x23   :  { %p576_p2 = por %p575_p1, %p574_p0 }
  0x25   :  { %p577_p3 = pnand %p576_p2, %p570_p13 }
  0x27   :  { %580 = shalt.err (!%p577_p3)
}
  0x28   :  { %s652_s1 = smov 16   ;;  %s653_s22 = smov 1  }
  0x29   :  { %29 = dma.hbm_to_vmem [thread:$0]  %s1125_s0, 160, %s24_s10, [#allocation4], %s652_s1, %s652_s1, %s653_s22  }
  0x2a   :  { %s581_s25 = scalar_lea.vmem %s37_s13, 16  ;;  %p586_p5 = scmp.lt.s32.totalorder %s37_s13, %s37_s13 }
  0x2b   :  { %p582_p4 = scmp.ne.s32.totalorder %s37_s13, %s581_s25  ;;  %p587_p6 = scmp.lt.s32.totalorder %s581_s25, %s581_s25 }
  0x2d   :  { %p588_p7 = por %p587_p6, %p586_p5 }
  0x2f   :  { %p589_p8 = pnand %p588_p7, %p582_p4 }
  0x31   :  { %592 = shalt.err (!%p589_p8)
}
  0x32   :  { %s654_s26 = smov [#allocation7]   ;;  %s56_s29 = sshll.u32 %s1128_s3, 4  ;;  %s57_s29 = int_to_ptr.vmem [resolvable:$true] %s56_s29 }
  0x33   :  { %39 = dma.vmem_to_smem %s37_s13, 16, %s654_s26, [#allocation6]  }
  0x34   :  { %s76_s9 = sshll.u32 %s1130_s5, 4  ;;  %s593_s0 = scalar_lea.vmem %s57_s29, 16  ;;  %s77_s9 = int_to_ptr.vmem [resolvable:$true] %s76_s9 }
  0x35   :  { %p594_p9 = scmp.ne.s32.totalorder %s57_s29, %s593_s0  ;;  %p598_p10 = scmp.lt.s32.totalorder %s57_s29, %s57_s29 }
  0x36   :  { %p599_p11 = scmp.lt.s32.totalorder %s593_s0, %s593_s0 }
  0x38   :  { %p600_p12 = por %p599_p11, %p598_p10 }
  0x3a   :  { %p601_p13 = pnand %p600_p12, %p594_p9 }
  0x3c   :  { %604 = shalt.err (!%p601_p13)
}
  0x3d   :  { %s655_s2 = smov [#allocation10]   ;;  %s605_s4 = scalar_lea.vmem %s77_s9, 16 }
  0x3e   :  { %59 = dma.vmem_to_smem %s57_s29, 16, %s655_s2, [#allocation9]  }
  0x3f   :  { %p606_p0 = scmp.ne.s32.totalorder %s77_s9, %s605_s4  ;;  %p610_p1 = scmp.lt.s32.totalorder %s77_s9, %s77_s9 }
  0x40   :  { %p611_p2 = scmp.lt.s32.totalorder %s605_s4, %s605_s4 }
  0x42   :  { %p612_p3 = por %p611_p2, %p610_p1 }
  0x44   :  { %p613_p4 = pnand %p612_p3, %p606_p0 }
  0x46   :  { %616 = shalt.err (!%p613_p4)
}
  0x47   :  { %s656_s3 = smov [#allocation13]  }
  0x48   :  { %79 = dma.vmem_to_smem %s77_s9, 16, %s656_s3, [#allocation12]  }
  0x49   :  { %639 = dma.done.wait [#allocation4], 160  }
  0x4a   :  { %640 = vsyncadd [#allocation4], 4294967136 }
  0x4b   :  { %641 = dma.done.wait [#allocation6], 16  }
  0x4c   :  { %642 = vsyncadd [#allocation6], 4294967280 }
  0x4d   :  { %643 = dma.done.wait [#allocation9], 32  }
  0x4e   :  { %644 = vsyncadd [#allocation9], 4294967264 }
  0x4f   :  { %645 = dma.done.wait [#allocation12], 32  }
  0x50   :  { %646 = vsyncadd [#allocation12], 4294967264 }
  0x51   :  { %100 = sfence }
  0x52   :  { %s725_s5 = sld [smem:[#allocation7]]  ;;  %s727_s10 = sld [smem:[#allocation7 + $0x1]]  ;;  %v753_v0 = vld [vmem:[#allocation3] sm:$0x1]  ;;  %v759_v1 = vld [vmem:[#allocation3 + $0x1] sm:$0x1] }
  0x53   :  { %s729_s11 = sld [smem:[#allocation7 + $0x2]]  ;;  %s731_s12 = sld [smem:[#allocation7 + $0x3]]  ;;  %v765_v2 = vld [vmem:[#allocation3 + $0x2] sm:$0x1]  ;;  %v773_v5 = vld [vmem:[#allocation3 + $0x3] sm:$0x1] }
  0x54   :  { %s733_s13 = sld [smem:[#allocation7 + $0x4]]  ;;  %s735_s14 = sld [smem:[#allocation7 + $0x5]]  ;;  %v775_v6 = vld [vmem:[#allocation3 + $0x4] sm:$0x1]  ;;  %v782_v8 = vld [vmem:[#allocation3 + $0x5] sm:$0x1] }
  0x55   :  { %s737_s15 = sld [smem:[#allocation7 + $0x6]]  ;;  %s739_s16 = sld [smem:[#allocation7 + $0x7]]  ;;  %v784_v9 = vld [vmem:[#allocation3 + $0x6] sm:$0x1]  ;;  %v790_v10 = vld [vmem:[#allocation3 + $0x7] sm:$0x1] }
  0x56   :  { %s741_s17 = sld [smem:[#allocation7 + $0x8]]  ;;  %s743_s18 = sld [smem:[#allocation7 + $0x9]]  ;;  %v804_v15 = vld [vmem:[#allocation3 + $0x8] sm:$0x1]  ;;  %v816_v20 = vld [vmem:[#allocation3 + $0x9] sm:$0x1] }
  0x57   :  { %s745_s19 = sld [smem:[#allocation7 + $0xa]]  ;;  %s747_s20 = sld [smem:[#allocation7 + $0xb]] }
  0x58   :  { %s749_s21 = sld [smem:[#allocation7 + $0xc]]  ;;  %s751_s1 = sld [smem:[#allocation7 + $0xd]]  ;;  %v206_v3 = vstv %s725_s5  ;;  %v210_v4 = vstv %s727_s10 }
  0x59   :  { %s755_s22 = sld [smem:[#allocation7 + $0xe]]  ;;  %s757_s23 = sld [smem:[#allocation7 + $0xf]]  ;;  %v213_v7 = vstv %s729_s11  ;;  %v793_v11 = vmul.f32 %v206_v3, %v753_v0  ;;  %v796_v12 = vmul.f32 %v210_v4, %v759_v1  ;;  %v216_v13 = vstv %s731_s12 }
  0x5a   :  { %s761_s24 = sld [smem:[#allocation7 + $0x10]]  ;;  %s763_s25 = sld [smem:[#allocation7 + $0x11]]  ;;  %v219_v14 = vstv %s733_s13  ;;  %v807_v16 = vmul.f32 %v213_v7, %v765_v2  ;;  %v222_v17 = vstv %s735_s14  ;;  %v827_v25 = vmul.f32 %v216_v13, %v773_v5 }
  0x5b   :  { %s769_s26 = sld [smem:[#allocation7 + $0x12]]  ;;  %s771_s27 = sld [smem:[#allocation7 + $0x13]]  ;;  %v225_v18 = vstv %s737_s15  ;;  %v228_v19 = vstv %s739_s16  ;;  %v830_v26 = vmul.f32 %v219_v14, %v775_v6  ;;  %v839_v29 = vmul.f32 %v222_v17, %v782_v8 }
  0x5c   :  { %s778_s28 = sld [smem:[#allocation7 + $0x14]]  ;;  %s780_s29 = sld [smem:[#allocation7 + $0x15]]  ;;  %v231_v21 = vstv %s741_s17  ;;  %v234_v22 = vstv %s743_s18  ;;  %v842_v30 = vmul.f32 %v225_v18, %v784_v9  ;;  %v845_v31 = vmul.f32 %v228_v19, %v790_v10 }
  0x5d   :  { %s786_s30 = sld [smem:[#allocation7 + $0x16]]  ;;  %s788_s8 = sld [smem:[#allocation7 + $0x17]]  ;;  %v238_v23 = vstv %s745_s19  ;;  %v242_v24 = vstv %s747_s20  ;;  %v853_v33 = vmul.f32 %v231_v21, %v804_v15  ;;  %v856_v34 = vmul.f32 %v234_v22, %v816_v20 }
  0x5e   :  { %s800_s9 = sld [smem:[#allocation7 + $0x18]]  ;;  %s802_s0 = sld [smem:[#allocation7 + $0x19]]  ;;  %v245_v27 = vstv %s749_s21  ;;  %v248_v28 = vstv %s751_s1  ;;  %v859_v35 = vmul.f32 %v238_v23, %v753_v0  ;;  %v862_v36 = vmul.f32 %v242_v24, %v759_v1 }
  0x5f   :  { %s812_s2 = sld [smem:[#allocation7 + $0x1a]]  ;;  %s814_s4 = sld [smem:[#allocation7 + $0x1b]]  ;;  %v251_v32 = vstv %s755_s22  ;;  %v869_v37 = vmul.f32 %v245_v27, %v765_v2  ;;  %v872_v38 = vmul.f32 %v248_v28, %v773_v5  ;;  %v254_v39 = vstv %s757_s23 }
  0x60   :  { %s822_s3 = sld [smem:[#allocation7 + $0x1c]]  ;;  %s824_s5 = sld [smem:[#allocation7 + $0x1d]]  ;;  %v257_v40 = vstv %s761_s24  ;;  %v879_v41 = vmul.f32 %v251_v32, %v775_v6  ;;  %v260_v42 = vstv %s763_s25  ;;  %v893_v49 = vmul.f32 %v254_v39, %v782_v8 }
  0x61   :  { %s834_s10 = sld [smem:[#allocation7 + $0x1e]]  ;;  %s836_s11 = sld [smem:[#allocation7 + $0x1f]]  ;;  %v263_v43 = vstv %s769_s26  ;;  %v266_v44 = vstv %s771_s27  ;;  %v896_v50 = vmul.f32 %v257_v40, %v784_v9  ;;  %v905_v53 = vmul.f32 %v260_v42, %v790_v10 }
  0x62   :  { %s848_s12 = sld [smem:[#allocation7 + $0x20]]  ;;  %s850_s13 = sld [smem:[#allocation7 + $0x21]]  ;;  %v270_v45 = vstv %s778_s28  ;;  %v274_v46 = vstv %s780_s29  ;;  %v908_v54 = vmul.f32 %v263_v43, %v804_v15  ;;  %v911_v55 = vmul.f32 %v266_v44, %v816_v20 }
  0x63   :  { %s864_s14 = sld [smem:[#allocation7 + $0x22]]  ;;  %s866_s15 = sld [smem:[#allocation7 + $0x23]]  ;;  %v277_v47 = vstv %s786_s30  ;;  %v280_v48 = vstv %s788_s8  ;;  %v271_v57 = vmul.f32 %v270_v45, %v753_v0  ;;  %v275_v58 = vmul.f32 %v274_v46, %v759_v1 }
  0x64   :  { %s876_s16 = sld [smem:[#allocation7 + $0x24]]  ;;  %s884_s17 = sld [smem:[#allocation7 + $0x28]]  ;;  %v283_v51 = vstv %s800_s9  ;;  %v286_v52 = vstv %s802_s0  ;;  %v919_v59 = vmul.f32 %v277_v47, %v765_v2  ;;  %v922_v60 = vmul.f32 %v280_v48, %v773_v5 }
  0x65   :  { %s886_s18 = sld [smem:[#allocation7 + $0x29]]  ;;  %s900_s19 = sld [smem:[#allocation7 + $0x25]]  ;;  %v289_v56 = vstv %s812_s2  ;;  %v927_v61 = vmul.f32 %v283_v51, %v775_v6  ;;  %v930_v62 = vmul.f32 %v286_v52, %v782_v8  ;;  %v292_v63 = vstv %s814_s4 }
  0x66   :  { %s902_s20 = sld [smem:[#allocation7 + $0x2a]]  ;;  %s914_s21 = sld [smem:[#allocation7 + $0x2b]]  ;;  %v295_v3 = vstv %s822_s3  ;;  %v939_v4 = vmul.f32 %v289_v56, %v784_v9  ;;  %v298_v7 = vstv %s824_s5  ;;  %v955_v22 = vmul.f32 %v292_v63, %v790_v10 }
  0x67   :  { %s924_s1 = sld [smem:[#allocation7 + $0x2c]]  ;;  %s934_s22 = sld [smem:[#allocation8]]  ;;  %v302_v13 = vstv %s834_s10  ;;  %v306_v14 = vstv %s836_s11  ;;  %v958_v23 = vmul.f32 %v295_v3, %v804_v15  ;;  %v965_v28 = vmul.f32 %v298_v7, %v816_v20 }
  0x68   :  { %s936_s23 = sld [smem:[#allocation8 + $0x1]]  ;;  %s944_s24 = sld [smem:[#allocation8 + $0x2]]  ;;  %v309_v17 = vstv %s848_s12  ;;  %v312_v18 = vstv %s850_s13  ;;  %v303_v32 = vmul.f32 %v302_v13, %v753_v0  ;;  %v307_v39 = vmul.f32 %v306_v14, %v759_v1 }
  0x69   :  { %s946_s25 = sld [smem:[#allocation8 + $0x3]]  ;;  %v315_v19 = vstv %s864_s14  ;;  %v318_v21 = vstv %s866_s15  ;;  %s952_s26 = sld [smem:[#allocation8 + $0x4]]  ;;  %v310_v42 = vmul.f32 %v309_v17, %v765_v2  ;;  %v313_v43 = vmul.f32 %v312_v18, %v773_v5 }
  0x6a   :  { %v321_v24 = vstv %s876_s16  ;;  %v334_v27 = vstv %s884_s17  ;;  %s962_s27 = sld [smem:[#allocation7 + $0x2d]]  ;;  %s970_s28 = sld [smem:[#allocation7 + $0x26]]  ;;  %v316_v44 = vmul.f32 %v315_v19, %v775_v6  ;;  %v976_v45 = vmul.f32 %v318_v21, %v782_v8 }
  0x6b   :  { %v338_v40 = vstv %s886_s18  ;;  %s978_s29 = sld [smem:[#allocation7 + $0x2e]]  ;;  %v981_v46 = vmul.f32 %v321_v24, %v784_v9  ;;  %v324_v47 = vstv %s900_s19  ;;  %v335_v48 = vmul.f32 %v334_v27, %v753_v0  ;;  %s986_s30 = sld [smem:[#allocation7 + $0x27]] }
  0x6c   :  { %v341_v51 = vstv %s902_s20  ;;  %v339_v63 = vmul.f32 %v338_v40, %v759_v1  ;;  %v344_v3 = vstv %s914_s21  ;;  %s992_s8 = sld [smem:[#allocation7 + $0x2f]]  ;;  %s998_s9 = sld [smem:[#allocation7 + $0x30]] }
  0x6d   :  { %v208_v52 = vstv %s934_s22  ;;  %v342_v21 = vmul.f32 %v341_v51, %v765_v2  ;;  %s1002_s0 = sld [smem:[#allocation7 + $0x31]]  ;;  %v347_v27 = vstv %s924_s1  ;;  %s1015_s2 = sld [smem:[#allocation10]] }
  0x6e   :  { %v240_v56 = vstv %s936_s23  ;;  %v209_v7 = vadd.f32 %v208_v52, %v793_v11  ;;  %v272_v14 = vstv %s944_s24  ;;  %v325_v52 = vmul.f32 %v324_v47, %v790_v10  ;;  %s1020_s4 = sld [smem:[#allocation10 + $0x1]]  ;;  %s1022_s3 = sld [smem:[#allocation10 + $0x2]] }
  0x6f   :  { %v241_v13 = vadd.f32 %v240_v56, %v859_v35  ;;  %v304_v17 = vstv %s946_s25  ;;  %v273_v0 = vadd.f32 %v272_v14, %v271_v57  ;;  %v336_v19 = vstv %s952_s26  ;;  %s1027_s5 = sld [smem:[#allocation10 + $0x3]]  ;;  %s1032_s10 = sld [smem:[#allocation10 + $0x4]] }
  0x70   :  { %v305_v18 = vadd.f32 %v304_v17, %v303_v32  ;;  %v212_v1 = vadd.f32 %v796_v12, %v209_v7  ;;  %v337_v11 = vadd.f32 %v336_v19, %v335_v48  ;;  %v345_v57 = vmul.f32 %v344_v3, %v773_v5  ;;  %s1034_s11 = sld [smem:[#allocation10 + $0x5]]  ;;  %s1039_s12 = sld [smem:[#allocation10 + $0x6]] }
  0x71   :  { %v244_v24 = vadd.f32 %v862_v36, %v241_v13  ;;  %v276_v35 = vadd.f32 %v275_v58, %v273_v0  ;;  %v350_v56 = vstv %s962_s27  ;;  %v327_v36 = vstv %s970_s28  ;;  %s1044_s13 = sld [smem:[#allocation10 + $0x7]]  ;;  %s1046_s14 = sld [smem:[#allocation10 + $0x8]] }
  0x72   :  { %v308_v40 = vadd.f32 %v307_v39, %v305_v18  ;;  %v215_v32 = vadd.f32 %v807_v16, %v212_v1  ;;  %v340_v51 = vadd.f32 %v339_v63, %v337_v11  ;;  %v348_v48 = vmul.f32 %v347_v27, %v775_v6  ;;  %s1052_s15 = sld [smem:[#allocation10 + $0xa]]  ;;  %s1054_s16 = sld [smem:[#allocation10 + $0xb]] }
  0x73   :  { %v247_v2 = vadd.f32 %v869_v37, %v244_v24  ;;  %v279_v12 = vadd.f32 %v919_v59, %v276_v35  ;;  %v353_v16 = vstv %s978_s29  ;;  %v351_v6 = vmul.f32 %v350_v56, %v782_v8  ;;  %s1059_s17 = sld [smem:[#allocation11]]  ;;  %s1061_s18 = sld [smem:[#allocation11 + $0x1]] }
  0x74   :  { %v311_v7 = vadd.f32 %v310_v42, %v308_v40  ;;  %v218_v58 = vadd.f32 %v827_v25, %v215_v32  ;;  %v343_v39 = vadd.f32 %v342_v21, %v340_v51  ;;  %v330_v42 = vstv %s986_s30  ;;  %s1070_s19 = sld [smem:[#allocation10 + $0xc]]  ;;  %s1072_s20 = sld [smem:[#allocation11 + $0x2]] }
  0x75   :  { %v250_v5 = vadd.f32 %v872_v38, %v247_v2  ;;  %v282_v37 = vadd.f32 %v922_v60, %v279_v12  ;;  %v356_v63 = vstv %s992_s8  ;;  %v359_v13 = vstv %s998_s9  ;;  %s1080_s21 = sld [smem:[#allocation10 + $0x9]]  ;;  %s1082_s1 = sld [smem:[#allocation10 + $0xd]] }
  0x76   :  { %v314_v59 = vadd.f32 %v313_v43, %v311_v7  ;;  %v221_v25 = vadd.f32 %v830_v26, %v218_v58  ;;  %v346_v47 = vadd.f32 %v345_v57, %v343_v39  ;;  %v354_v43 = vmul.f32 %v353_v16, %v784_v9  ;;  %s1090_s22 = sld [smem:[#allocation10 + $0xe]]  ;;  %s1101_s23 = sld [smem:[#allocation13]] }
  0x77   :  { %v253_v38 = vadd.f32 %v879_v41, %v250_v5  ;;  %v285_v3 = vadd.f32 %v927_v61, %v282_v37  ;;  %v362_v41 = vstv %s1002_s0  ;;  %v331_v9 = vmul.f32 %v330_v42, %v816_v20  ;;  %s1103_s24 = sld [smem:[#allocation13 + $0x1]]  ;;  %s525_s25 = sld [smem:[#allocation13 + $0x2]] }
  0x78   :  { %v317_v60 = vadd.f32 %v316_v44, %v314_v59  ;;  %v224_v8 = vadd.f32 %v839_v29, %v221_v25  ;;  %v349_v14 = vadd.f32 %v348_v48, %v346_v47  ;;  %v328_v44 = vmul.f32 %v327_v36, %v804_v15  ;;  %s657_s28 = smov [#allocation14]  }
  0x79   :  { %v256_v26 = vadd.f32 %v893_v49, %v253_v38  ;;  %v288_v17 = vadd.f32 %v930_v62, %v285_v3  ;;  %v357_v18 = vmul.f32 %v356_v63, %v790_v10  ;;  %v360_v19 = vmul.f32 %v359_v13, %v804_v15  ;;  %s434_s29 = sshll.u32 %s657_s28, 4  ;;  %s435_s29 = int_to_ptr.vmem [resolvable:$true] %s434_s29 }
  0x7a   :  { %v320_v61 = vadd.f32 %v976_v45, %v317_v60  ;;  %v227_v29 = vadd.f32 %v842_v30, %v224_v8  ;;  %v352_v0 = vadd.f32 %v351_v6, %v349_v14  ;;  %v363_v30 = vmul.f32 %v362_v41, %v816_v20  ;;  %s617_s30 = scalar_lea.vmem %s435_s29, 16  ;;  %s621_s8 = scalar_lea.vmem %s435_s29, 32 }
  0x7b   :  { %v259_v49 = vadd.f32 %v896_v50, %v256_v26  ;;  %v291_v62 = vadd.f32 %v939_v4, %v288_v17  ;;  %v366_v10 = vstv %s1015_s2  ;;  %v370_v24 = vstv %s1020_s4  ;;  %p618_p5 = scmp.ne.s32.totalorder %s435_s29, %s617_s30  ;;  %p622_p6 = scmp.lt.s32.totalorder %s435_s29, %s435_s29 }
  0x7c   :  { %v323_v45 = vadd.f32 %v981_v46, %v320_v61  ;;  %v230_v50 = vadd.f32 %v845_v31, %v227_v29  ;;  %v355_v1 = vadd.f32 %v354_v43, %v352_v0  ;;  %v373_v15 = vstv %s1022_s3  ;;  %p623_p7 = scmp.lt.s32.totalorder %s621_s8, %s617_s30 }
  0x7d   :  { %v262_v21 = vadd.f32 %v905_v53, %v259_v49  ;;  %v294_v4 = vadd.f32 %v955_v22, %v291_v62  ;;  %v376_v11 = vstv %s1027_s5  ;;  %v379_v35 = vstv %s1032_s10 }
  0x7e   :  { %v326_v46 = vadd.f32 %v325_v52, %v323_v45  ;;  %v233_v20 = vadd.f32 %v853_v33, %v230_v50  ;;  %v358_v53 = vadd.f32 %v357_v18, %v355_v1  ;;  %v383_v40 = vstv %s1034_s11  ;;  %p624_p8 = por %p623_p7, %p622_p6 }
  0x7f   :  { %v265_v31 = vadd.f32 %v908_v54, %v262_v21  ;;  %v297_v27 = vadd.f32 %v958_v23, %v294_v4  ;;  %v387_v57 = vstv %s1039_s12  ;;  %v390_v51 = vstv %s1044_s13 }
  0x80   :  { %v329_v22 = vadd.f32 %v328_v44, %v326_v46  ;;  %v236_v33 = vadd.f32 %v856_v34, %v233_v20  ;;  %v361_v52 = vadd.f32 %v360_v19, %v358_v53  ;;  %v393_v23 = vstv %s1046_s14  ;;  %p625_p9 = pnand %p624_p8, %p618_p5 }
  0x81   :  { %v268_v54 = vadd.f32 %v911_v55, %v265_v31  ;;  %v300_v32 = vadd.f32 %v965_v28, %v297_v27  ;;  %v400_v36 = vstv %s1052_s15  ;;  %v368_v34 = vstv %s1059_s17 }
  0x82   :  { %v332_v2 = vadd.f32 %v331_v9, %v329_v22  ;;  %v237_v56 = vmax.f32 %v236_v33, 0.0  ;;  %v364_v7 = vadd.f32 %v363_v30, %v361_v52  ;;  %v385_v58 = vstv %s1061_s18 }
  0x83   :  { %v269_v12 = vmax.f32 %v268_v54, 0.0  ;;  %v301_v48 = vmax.f32 %v300_v32, 0.0  ;;  %v404_v55 = vstv %s1054_s16  ;;  %v402_v42 = vstv %s1072_s20 }
  0x84   :  { %v333_v5 = vmax.f32 %v332_v2, 0.0  ;;  %v367_v39 = vmul.f32 %v366_v10, %v237_v56  ;;  %v384_v37 = vmul.f32 %v383_v40, %v237_v56  ;;  %v365_v28 = vmax.f32 %v364_v7, 0.0 }
  0x85   :  { %v371_v16 = vmul.f32 %v370_v24, %v269_v12  ;;  %v388_v59 = vmul.f32 %v387_v57, %v269_v12  ;;  %v407_v6 = vstv %s1070_s19  ;;  %v374_v38 = vmul.f32 %v373_v15, %v301_v48 }
  0x86   :  { %v369_v25 = vadd.f32 %v368_v34, %v367_v39  ;;  %v386_v47 = vadd.f32 %v385_v58, %v384_v37  ;;  %v391_v63 = vmul.f32 %v390_v51, %v301_v48  ;;  %v396_v3 = vstv %s1080_s21 }
  0x87   :  { %v401_v60 = vmul.f32 %v400_v36, %v237_v56  ;;  %v405_v43 = vmul.f32 %v404_v55, %v269_v12  ;;  %v410_v13 = vstv %s1082_s1  ;;  %v377_v26 = vmul.f32 %v376_v11, %v333_v5 }
  0x88   :  { %v372_v8 = vadd.f32 %v371_v16, %v369_v25  ;;  %v389_v14 = vadd.f32 %v388_v59, %v386_v47  ;;  %v394_v41 = vmul.f32 %v393_v23, %v333_v5  ;;  %v408_v61 = vmul.f32 %v407_v6, %v301_v48 }
  0x89   :  { %v403_v17 = vadd.f32 %v402_v42, %v401_v60  ;;  %v413_v44 = vstv %s1090_s22  ;;  %v380_v29 = vmul.f32 %v379_v35, %v365_v28  ;;  %v397_v0 = vmul.f32 %v396_v3, %v365_v28 }
  0x8a   :  { %v375_v9 = vadd.f32 %v374_v38, %v372_v8  ;;  %v392_v49 = vadd.f32 %v391_v63, %v389_v14  ;;  %v411_v62 = vmul.f32 %v410_v13, %v333_v5  ;;  %v414_v50 = vmul.f32 %v413_v44, %v365_v28 }
  0x8b   :  { %v406_v18 = vadd.f32 %v405_v43, %v403_v17  ;;  %v417_v4 = vstv %s1101_s23  ;;  %v421_v46 = vstv %s1103_s24  ;;  %v419_v31 = vstv %s1131_s6 }
  0x8c   :  { %v378_v45 = vadd.f32 %v377_v26, %v375_v9  ;;  %v395_v19 = vadd.f32 %v394_v41, %v392_v49  ;;  %v424_v27 = vstv %s525_s25 }
  0x8d   :  { %v409_v30 = vadd.f32 %v408_v61, %v406_v18 }
  0x8e   :  { %v381_v21 = vadd.f32 %v380_v29, %v378_v45  ;;  %v398_v1 = vadd.f32 %v397_v0, %v395_v19 }
  0x8f   :  { %v412_v10 = vadd.f32 %v411_v62, %v409_v30 }
  0x90   :  { %v382_v24 = vmax.f32 %v381_v21, 0.0  ;;  %v399_v15 = vmax.f32 %v398_v1, 0.0 }
  0x91   :  { %v415_v20 = vadd.f32 %v414_v50, %v412_v10 }
  0x92   :  { %v418_v53 = vmul.f32 %v417_v4, %v382_v24  ;;  %v422_v11 = vmul.f32 %v421_v46, %v399_v15 }
  0x93   :  { %v416_v22 = vmax.f32 %v415_v20, 0.0 }
  0x94   :  { %v420_v35 = vadd.f32 %v419_v31, %v418_v53 }
  0x95   :  { %v425_v40 = vmul.f32 %v424_v27, %v416_v22 }
  0x96   :  { %v423_v33 = vadd.f32 %v422_v11, %v420_v35 }
  0x98   :  { %v426_v54 = vadd.f32 %v425_v40, %v423_v33 }
  0x9a   :  { %427 = vst [vmem:[#allocation14] sm:$0x1] %v426_v54 }
  0x9b   :  { %628 = shalt.err (!%p625_p9)
}
  0x9c   :  { %s629_s0 = scalar_lea.hbm %s1132_s7, 16 }
  0x9d   :  { %p630_p10 = scmp.ne.s32.totalorder %s1132_s7, %s629_s0  ;;  %p633_p11 = scmp.lt.u32.totalorder %s629_s0, %s1132_s7 }
  0x9f   :  { %p635_p12 = pnand %p633_p11, %p630_p10 }
  0xa1   :  { %638 = shalt.err (!%p635_p12)
}
  0xa2   :  { %437 = dma.vmem_to_hbm [thread:$0]  %s435_s29, 16, %s1132_s7, [#allocation5]  }
  0xa3   :  { %647 = dma.done.wait [#allocation5], 16  }
  0xa4   :  { %648 = vsyncadd [#allocation5], 4294967280 }
  0xa5   :  { %441 = vsyncpa [#allocation4], 1 }
  0xa6   :  { %442 = vsyncpa [#allocation5], 1 }
  0xa7   :  { %443 = vsyncpa [#allocation6], 1 }
  0xa8   :  { %444 = vsyncpa [#allocation9], 1 }
  0xa9   :  { %445 = vsyncpa [#allocation12], 1 }

</bundles_post_ra>
